<compile_context>
chip_gen: v6e
topology: v6e:2x2x1
jax: 0.10.0
libtpu: 0.0.40
codegen_flags: <defaults>
</compile_context>

<pallas_src>
import math

import jax
import jax.numpy as jnp
from jax import lax
from jax.experimental import pallas as pl
from jax.experimental.pallas import tpu as pltpu

COMPUTE_DTYPE = jnp.bfloat16   # MXU streams bf16, accumulates f32
LANE = 128                     # vreg lane width: feature dims padded to this


# ------------------------------ small helpers --------------------------------

def _round_up(x, m):
    return ((x + m - 1) // m) * m


def _pad2d(a, rows, cols):
    r, c = a.shape
    if r == rows and c == cols:
        return a
    return jnp.pad(a, ((0, rows - r), (0, cols - c)))


def _vmem_limit_bytes():
    """Generation-aware VMEM budget: ~85% of per-core physical VMEM."""
    try:
        cap = pltpu.get_tpu_info().vmem_capacity_bytes
        return int(cap * 0.85)
    except Exception:
        return 64 * 1024 * 1024   # safe fallback


def _prep_params(params, compute_dtype):
    """Pad weights/bias to 128-lane multiples, pre-cast to bf16, build [Wu|Wv]."""
    prepped = []
    for wu, wv, b in params:
        in_d, out_d = wu.shape
        in_p, out_p = _round_up(in_d, LANE), _round_up(out_d, LANE)
        wu_p = _pad2d(jnp.asarray(wu, jnp.float32), in_p, out_p).astype(compute_dtype)
        wv_p = _pad2d(jnp.asarray(wv, jnp.float32), in_p, out_p).astype(compute_dtype)
        b_p = _pad2d(jnp.asarray(b, jnp.float32).reshape(1, -1), 1, out_p)   # f32
        w_cat = jnp.concatenate([wu_p, wv_p], axis=1)                        # (in_p, 2*out_p)
        prepped.append(dict(wu=wu_p, wv=wv_p, w_cat=w_cat, b=b_p,
                            in_p=in_p, out_p=out_p))
    return prepped


def _masked_log_softmax(y, nclass):
    """Numerically stable row-wise log-softmax over the first `nclass` columns."""
    col = lax.broadcasted_iota(jnp.int32, y.shape, 1)
    ym = jnp.where(col < nclass, y, -jnp.inf)
    m = jnp.max(ym, axis=1, keepdims=True)
    s = ym - m
    lse = jnp.log(jnp.sum(jnp.exp(s), axis=1, keepdims=True))
    return s - lse


# --------------------- fused path (whole forward, 1 call) --------------------

def _make_fused_kernel(n_layers, out_pads, nclass, compute_dtype):
    def kernel(y_ref, adj_hbm_ref, *rest):
        # rest = (wcat_0, b_0, ..., wcat_{L-1}, b_{L-1}, out_ref, adj_vmem, dma_sem)
        out_ref = rest[2 * n_layers]
        adj_vmem = rest[2 * n_layers + 1]
        dma_sem = rest[2 * n_layers + 2]

        # Start the (largest) HBM->VMEM transfer now; layer-0's feature matmul
        # does not need the adjacency, so the DMA overlaps with MXU work.
        adj_cp = pltpu.make_async_copy(adj_hbm_ref, adj_vmem, dma_sem.at[0])
        adj_cp.start()

        y = y_ref[...]                       # (N, in_p0) bf16, stays on-chip
        adj_c = None
        for l in range(n_layers):
            w_cat = rest[2 * l][...]         # (in_p, 2*out_p) bf16
            b = rest[2 * l + 1][...]         # (1, out_p) f32
            out_p = out_pads[l]
            yc = y.astype(compute_dtype)
            # one MXU pass for both feature-side matmuls: Z = Y @ [Wu | Wv]
            z = jnp.dot(yc, w_cat, preferred_element_type=jnp.float32)
            if adj_c is None:
                adj_cp.wait()                # adjacency first needed only now
                adj_c = adj_vmem[...]
            zu = z[:, :out_p]                        # tile-aligned slices
            yv = z[:, out_p:].astype(compute_dtype)
            # neighborhood term adj.T @ (Y @ Wv); transpose folded into the
            # contraction ((0,)-(0,)) instead of a host-side adj.T pass.
            zv = lax.dot_general(adj_c, yv, (((0,), (0,)), ((), ())),
                                 preferred_element_type=jnp.float32)
            y = jnp.maximum(zu + zv + b, 0.0)        # fused bias + ReLU epilogue

        out_ref[...] = _masked_log_softmax(y, nclass).astype(out_ref.dtype)

    return kernel


def _gnn_forward_fused(y0_p, adj_c, prepped, nclass, compute_dtype, vmem_limit):
    N = y0_p.shape[0]
    n_layers = len(prepped)
    out_pads = [p["out_p"] for p in prepped]

    flat = []
    in_specs = [pl.BlockSpec(),                       # Y0: whole array in VMEM
                pl.BlockSpec(memory_space=pl.ANY)]    # adjacency stays in HBM
    for p in prepped:
        flat += [p["w_cat"], p["b"]]
        in_specs += [pl.BlockSpec(), pl.BlockSpec()]

    out_padded = pl.pallas_call(
        _make_fused_kernel(n_layers, out_pads, nclass, compute_dtype),
        out_shape=jax.ShapeDtypeStruct((N, out_pads[-1]), jnp.float32),
        in_specs=in_specs,
        out_specs=pl.BlockSpec(),
        scratch_shapes=[
            pltpu.VMEM(adj_c.shape, compute_dtype),   # single adjacency buffer
            pltpu.SemaphoreType.DMA((1,)),
        ],
        compiler_params=pltpu.CompilerParams(vmem_limit_bytes=vmem_limit),
    )(y0_p, adj_c, *flat)
    return out_padded[:, :nclass]


# ------------------- tiled path (one call per layer, big N) ------------------

def _make_tiled_layer_kernel(is_last, nclass, compute_dtype):
    def kernel(y_tile_ref, y_full_ref, adj_col_ref, wu_ref, wv_ref, b_ref, o_ref):
        # feature path on this row tile
        zu = jnp.dot(y_tile_ref[...], wu_ref[...], preferred_element_type=jnp.float32)
        # neighborhood path: (adj[:, tile].T @ Y_full) @ Wv; transpose folded in
        ay = lax.dot_general(adj_col_ref[...], y_full_ref[...],
                             (((0,), (0,)), ((), ())),
                             preferred_element_type=jnp.float32)
        zv = jnp.dot(ay.astype(compute_dtype), wv_ref[...],
                     preferred_element_type=jnp.float32)
        h = jnp.maximum(zu + zv + b_ref[...], 0.0)
        if is_last:
            o_ref[...] = _masked_log_softmax(h, nclass).astype(o_ref.dtype)
        else:
            o_ref[...] = h.astype(o_ref.dtype)
    return kernel


def _gnn_forward_tiled(y0, adj, prepped, nclass, compute_dtype, vmem_limit, row_tile):
    N = y0.shape[0]
    in_p0 = prepped[0]["in_p"]
    in_p_max = max(p["in_p"] for p in prepped)

    # adjacency column tiles need a 128-lane-multiple width (last BlockSpec dim);
    # shrink the tile until the per-step working set fits the VMEM budget.
    row_tile = max(LANE, _round_up(row_tile, LANE))
    while True:
        n_pad = _round_up(max(N, row_tile), row_tile)
        work = (2 * 2 * n_pad * row_tile              # double-buffered bf16 adj col tile
                + 2 * n_pad * in_p_max                # resident bf16 activations
                + sum(2 * (p["wu"].size + p["wv"].size) for p in prepped))
        if work <= int(0.8 * vmem_limit) or row_tile <= LANE:
            break
        row_tile = max(LANE, _round_up(row_tile // 2, LANE))
    N_pad = _round_up(max(N, row_tile), row_tile)
    n_tiles = N_pad // row_tile

    y = _pad2d(jnp.asarray(y0, jnp.float32), N_pad, in_p0).astype(compute_dtype)
    adj_c = _pad2d(jnp.asarray(adj, jnp.float32), N_pad, N_pad).astype(compute_dtype)

    for l, p in enumerate(prepped):
        is_last = l == len(prepped) - 1
        in_p, out_p = p["in_p"], p["out_p"]
        out_dtype = jnp.float32 if is_last else compute_dtype
        y = pl.pallas_call(
            _make_tiled_layer_kernel(is_last, nclass, compute_dtype),
            out_shape=jax.ShapeDtypeStruct((N_pad, out_p), out_dtype),
            grid=(n_tiles,),
            in_specs=[
                pl.BlockSpec((row_tile, in_p), lambda i: (i, 0)),    # Y row tile
                pl.BlockSpec((N_pad, in_p), lambda i: (0, 0)),       # full Y (resident)
                pl.BlockSpec((N_pad, row_tile), lambda i: (0, i)),   # adj column tile
                pl.BlockSpec((in_p, out_p), lambda i: (0, 0)),       # Wu
                pl.BlockSpec((in_p, out_p), lambda i: (0, 0)),       # Wv
                pl.BlockSpec((1, out_p), lambda i: (0, 0)),          # bias
            ],
            out_specs=pl.BlockSpec((row_tile, out_p), lambda i: (i, 0)),
            compiler_params=pltpu.CompilerParams(
                dimension_semantics=("parallel",),    # shard row tiles across TCs
                vmem_limit_bytes=vmem_limit,
            ),
        )(y, y, adj_c, p["wu"], p["wv"], p["b"])
    return y[:N, :nclass]


# ------------------------------- public entry --------------------------------

def gnn_forward(X, adj, params, compute_dtype=COMPUTE_DTYPE,
                force_tiled=False, row_tile=512):
    """Forward pass of GraphNeuralNetwork.

    X: (nfeat, N) in the PyTorch orientation; adj: (N, N) dense adjacency.
    Returns (N, nclass) log-probabilities == F.log_softmax(model(X).T? ...) i.e.
    identical to the PyTorch module's output.
    """
    y0 = jnp.asarray(X, jnp.float32).T          # node-major (N, nfeat)
    N = y0.shape[0]
    nclass = params[-1][0].shape[1]
    prepped = _prep_params(params, compute_dtype)
    vmem_limit = _vmem_limit_bytes()

    # rough VMEM footprint of the fully fused, fully resident path
    in_p0 = prepped[0]["in_p"]
    fused_bytes = 2 * N * N + 2 * N * in_p0     # bf16 adjacency + activations
    for p in prepped:
        fused_bytes += 2 * p["w_cat"].size + 4 * p["b"].size
        fused_bytes += 4 * N * (4 * p["out_p"])  # f32 z / zv / y temporaries

    if force_tiled or fused_bytes > int(0.7 * vmem_limit):
        return _gnn_forward_tiled(y0, adj, prepped, nclass, compute_dtype,
                                  vmem_limit, row_tile)

    y0_p = _pad2d(y0, N, in_p0).astype(compute_dtype)
    adj_c = jnp.asarray(adj).astype(compute_dtype)   # no host transpose
    return _gnn_forward_fused(y0_p, adj_c, prepped, nclass, compute_dtype, vmem_limit)


# -------------------------------- references ---------------------------------

def gnn_forward_ref(X, adj, params, compute_dtype=COMPUTE_DTYPE):
    """Pure-JAX reference with the same bf16-dot / f32-accum math as the kernel."""
    y = jnp.asarray(X, jnp.float32).T
    adj_c = jnp.asarray(adj).astype(compute_dtype)
    for wu, wv, b in params:
        yc = y.astype(compute_dtype)
        zu = jnp.dot(yc, wu.astype(compute_dtype), preferred_element_type=jnp.float32)
        yv = jnp.dot(yc, wv.astype(compute_dtype), preferred_element_type=jnp.float32)
        zv = jnp.dot(adj_c.T, yv.astype(compute_dtype), preferred_element_type=jnp.float32)
        y = jnp.maximum(zu + zv + jnp.asarray(b, jnp.float32).reshape(1, -1), 0.0)
    return jax.nn.log_softmax(y, axis=1)


def gnn_forward_ref_f32(X, adj, params):
    """Full-f32 reference of the original PyTorch semantics (node-major)."""
    y = jnp.asarray(X, jnp.float32).T
    adjT = jnp.asarray(adj, jnp.float32).T
    for wu, wv, b in params:
        y = jnp.maximum(y @ wu + adjT @ (y @ wv)
                        + jnp.asarray(b, jnp.float32).reshape(1, -1), 0.0)
    return jax.nn.log_softmax(y, axis=1)


def init_gnn_params(key, nfeat, nhid, nclass):
    """Mirrors GNNLayer.__init__: uniform(-std, std) with std = 1/sqrt(out_d)."""
    dims = [nfeat] + list(nhid) + [nclass]
    params = []
    for i in range(1, len(dims)):
        in_d, out_d = dims[i - 1], dims[i]
        std = 1.0 / math.sqrt(out_d)
        key, ku, kv, kb = jax.random.split(key, 4)
        wu = jax.random.uniform(ku, (in_d, out_d), jnp.float32, -std, std)
        wv = jax.random.uniform(kv, (in_d, out_d), jnp.float32, -std, std)
        b = jax.random.uniform(kb, (1, out_d), jnp.float32, -std, std)
        params.append((wu, wv, b))
    return params


# ----------------------------------- main -------------------------------------

if __name__ == "__main__":
    nfeat, nhid, nclass, N = 8, [32], 4, 16

    key = jax.random.PRNGKey(0)
    kx, ka, kp = jax.random.split(key, 3)

    X = jax.random.normal(kx, (nfeat, N), jnp.float32)           # PyTorch orientation
    adj_raw = jax.random.uniform(ka, (N, N), jnp.float32)
    adj = adj_raw / jnp.sum(adj_raw, axis=1, keepdims=True)      # row-normalized

    params = init_gnn_params(kp, nfeat, nhid, nclass)

    # fused, fully VMEM-resident path
    out = gnn_forward(X, adj, params)
    jax.block_until_ready(out)
    assert out.shape == (N, nclass)
    assert jnp.allclose(jnp.sum(jnp.exp(out), axis=1), 1.0, atol=1e-4)

    ref = gnn_forward_ref(X, adj, params)
    assert jnp.allclose(out, ref, atol=1e-3, rtol=1e-3)

    ref32 = gnn_forward_ref_f32(X, adj, params)
    assert jnp.allclose(out, ref32, atol=1e-1, rtol=1e-1)

    # exercise the row-tiled large-graph path (parallel grid axis) at small shapes
    out_t = gnn_forward(X, adj, params, force_tiled=True, row_tile=128)
    jax.block_until_ready(out_t)
    assert out_t.shape == (N, nclass)
    assert jnp.allclose(out_t, ref32, atol=1e-1, rtol=1e-1)
    assert jnp.allclose(out_t, out, atol=1e-1, rtol=1e-1)

    print("KERNEL_OK")
</pallas_src>

<mosaic_0001>
module attributes {stable_mosaic.version = 11 : i64} {
  func.func @kernel(%arg0: memref<16x128xbf16, #tpu.memory_space<vmem>>, %arg1: memref<16x16xbf16, #tpu.memory_space<any>>, %arg2: memref<128x256xbf16, #tpu.memory_space<vmem>>, %arg3: memref<1x128xf32, #tpu.memory_space<vmem>>, %arg4: memref<128x256xbf16, #tpu.memory_space<vmem>>, %arg5: memref<1x128xf32, #tpu.memory_space<vmem>>, %arg6: memref<16x128xf32, #tpu.memory_space<vmem>>, %arg7: memref<16x16xbf16, #tpu.memory_space<vmem>>, %arg8: memref<1x!tpu.dma_semaphore, #tpu.memory_space<semaphore_mem>>) attributes {dimension_semantics = [], scalar_prefetch = 0 : i64, scratch_operands = 2 : i64, tpu.core_type = #tpu.core_type<tc>} {
    %c0_i32 = arith.constant 0 : i32
    %0 = tpu.memref_slice %arg8[%c0_i32] : memref<1x!tpu.dma_semaphore, #tpu.memory_space<semaphore_mem>> -> memref<1x!tpu.dma_semaphore, #tpu.memory_space<semaphore_mem>>
    %1 = tpu.memref_squeeze %0 : memref<1x!tpu.dma_semaphore, #tpu.memory_space<semaphore_mem>> -> memref<!tpu.dma_semaphore, #tpu.memory_space<semaphore_mem>>
    tpu.enqueue_dma source(%arg1 : memref<16x16xbf16, #tpu.memory_space<any>>) target(%arg7 : memref<16x16xbf16, #tpu.memory_space<vmem>>) target_semaphore(%1 : memref<!tpu.dma_semaphore, #tpu.memory_space<semaphore_mem>>)
    %c0 = arith.constant 0 : index
    %c0_0 = arith.constant 0 : index
    %2 = vector.load %arg0[%c0, %c0_0] : memref<16x128xbf16, #tpu.memory_space<vmem>>, vector<16x128xbf16>
    %c0_1 = arith.constant 0 : index
    %c0_2 = arith.constant 0 : index
    %3 = vector.load %arg2[%c0_1, %c0_2] : memref<128x256xbf16, #tpu.memory_space<vmem>>, vector<128x256xbf16>
    %c0_3 = arith.constant 0 : index
    %c0_4 = arith.constant 0 : index
    %4 = vector.load %arg3[%c0_3, %c0_4] : memref<1x128xf32, #tpu.memory_space<vmem>>, vector<1x128xf32>
    %cst = arith.constant dense<0.000000e+00> : vector<16x256xf32>
    %5 = tpu.matmul %2, %3, %cst {dimension_numbers = #tpu.dot_dimension_numbers<[1], [0], [0], [1], [0, 0, 1, 1], [], []>} : vector<16x128xbf16>, vector<128x256xbf16>, vector<16x256xf32> -> vector<16x256xf32>
    %c0_i32_5 = arith.constant 0 : i32
    %6 = tpu.memref_slice %arg8[%c0_i32_5] : memref<1x!tpu.dma_semaphore, #tpu.memory_space<semaphore_mem>> -> memref<1x!tpu.dma_semaphore, #tpu.memory_space<semaphore_mem>>
    %7 = tpu.memref_squeeze %6 : memref<1x!tpu.dma_semaphore, #tpu.memory_space<semaphore_mem>> -> memref<!tpu.dma_semaphore, #tpu.memory_space<semaphore_mem>>
    tpu.wait_dma2 semaphore(%7 : memref<!tpu.dma_semaphore, #tpu.memory_space<semaphore_mem>>) src(%arg1 : memref<16x16xbf16, #tpu.memory_space<any>>) dst(%arg7 : memref<16x16xbf16, #tpu.memory_space<vmem>>)
    %c0_6 = arith.constant 0 : index
    %c0_7 = arith.constant 0 : index
    %8 = vector.load %arg7[%c0_6, %c0_7] : memref<16x16xbf16, #tpu.memory_space<vmem>>, vector<16x16xbf16>
    %9 = vector.extract_strided_slice %5 {offsets = [0, 0], sizes = [16, 128], strides = [1, 1]} : vector<16x256xf32> to vector<16x128xf32>
    %10 = vector.extract_strided_slice %5 {offsets = [0, 128], sizes = [16, 128], strides = [1, 1]} : vector<16x256xf32> to vector<16x128xf32>
    %11 = arith.truncf %10 : vector<16x128xf32> to vector<16x128xbf16>
    %cst_8 = arith.constant dense<0.000000e+00> : vector<16x128xf32>
    %12 = tpu.matmul %8, %11, %cst_8 {dimension_numbers = #tpu.dot_dimension_numbers<[0], [0], [1], [1], [0, 1, 1, 1], [], []>} : vector<16x16xbf16>, vector<16x128xbf16>, vector<16x128xf32> -> vector<16x128xf32>
    %13 = arith.addf %9, %12 : vector<16x128xf32>
    %14 = vector.broadcast %4 : vector<1x128xf32> to vector<16x128xf32>
    %15 = arith.addf %13, %14 : vector<16x128xf32>
    %cst_9 = arith.constant 0.000000e+00 : f32
    %16 = vector.broadcast %cst_9 : f32 to vector<16x128xf32>
    %17 = arith.maximumf %15, %16 : vector<16x128xf32>
    %c0_10 = arith.constant 0 : index
    %c0_11 = arith.constant 0 : index
    %18 = vector.load %arg4[%c0_10, %c0_11] : memref<128x256xbf16, #tpu.memory_space<vmem>>, vector<128x256xbf16>
    %c0_12 = arith.constant 0 : index
    %c0_13 = arith.constant 0 : index
    %19 = vector.load %arg5[%c0_12, %c0_13] : memref<1x128xf32, #tpu.memory_space<vmem>>, vector<1x128xf32>
    %20 = arith.truncf %17 : vector<16x128xf32> to vector<16x128xbf16>
    %cst_14 = arith.constant dense<0.000000e+00> : vector<16x256xf32>
    %21 = tpu.matmul %20, %18, %cst_14 {dimension_numbers = #tpu.dot_dimension_numbers<[1], [0], [0], [1], [0, 0, 1, 1], [], []>} : vector<16x128xbf16>, vector<128x256xbf16>, vector<16x256xf32> -> vector<16x256xf32>
    %22 = vector.extract_strided_slice %21 {offsets = [0, 0], sizes = [16, 128], strides = [1, 1]} : vector<16x256xf32> to vector<16x128xf32>
    %23 = vector.extract_strided_slice %21 {offsets = [0, 128], sizes = [16, 128], strides = [1, 1]} : vector<16x256xf32> to vector<16x128xf32>
    %24 = arith.truncf %23 : vector<16x128xf32> to vector<16x128xbf16>
    %cst_15 = arith.constant dense<0.000000e+00> : vector<16x128xf32>
    %25 = tpu.matmul %8, %24, %cst_15 {dimension_numbers = #tpu.dot_dimension_numbers<[0], [0], [1], [1], [0, 1, 1, 1], [], []>} : vector<16x16xbf16>, vector<16x128xbf16>, vector<16x128xf32> -> vector<16x128xf32>
    %26 = arith.addf %22, %25 : vector<16x128xf32>
    %27 = vector.broadcast %19 : vector<1x128xf32> to vector<16x128xf32>
    %28 = arith.addf %26, %27 : vector<16x128xf32>
    %cst_16 = arith.constant 0.000000e+00 : f32
    %29 = vector.broadcast %cst_16 : f32 to vector<16x128xf32>
    %30 = arith.maximumf %28, %29 : vector<16x128xf32>
    %31 = tpu.iota {dimensions = array<i32: 1>} : vector<16x128xi32>
    %c4_i32 = arith.constant 4 : i32
    %32 = vector.broadcast %c4_i32 : i32 to vector<16x128xi32>
    %33 = arith.cmpi slt, %31, %32 : vector<16x128xi32>
    %cst_17 = arith.constant 0xFF800000 : f32
    %34 = vector.broadcast %cst_17 : f32 to vector<16x128xf32>
    %35 = arith.select %33, %30, %34 : vector<16x128xi1>, vector<16x128xf32>
    %cst_18 = arith.constant dense<0xFF800000> : vector<16xf32>
    %36 = vector.multi_reduction <maximumf>, %35, %cst_18 [1] : vector<16x128xf32> to vector<16xf32>
    %37 = vector.shape_cast %36 : vector<16xf32> to vector<16x1xf32>
    %38 = vector.broadcast %37 : vector<16x1xf32> to vector<16x128xf32>
    %39 = arith.subf %35, %38 : vector<16x128xf32>
    %40 = math.exp %39 : vector<16x128xf32>
    %cst_19 = arith.constant dense<0.000000e+00> : vector<16xf32>
    %41 = vector.multi_reduction <add>, %40, %cst_19 [1] : vector<16x128xf32> to vector<16xf32>
    %42 = vector.shape_cast %41 : vector<16xf32> to vector<16x1xf32>
    %43 = math.log %42 : vector<16x1xf32>
    %44 = vector.broadcast %43 : vector<16x1xf32> to vector<16x128xf32>
    %45 = arith.subf %39, %44 : vector<16x128xf32>
    %c0_20 = arith.constant 0 : index
    %c0_21 = arith.constant 0 : index
    %46 = vector.load %arg6[%c0_20, %c0_21] : memref<16x128xf32, #tpu.memory_space<vmem>>, vector<16x128xf32>
    tpu.vector_store %arg6[%c0_20, %c0_21], %45 {strides = array<i32>} : memref<16x128xf32, #tpu.memory_space<vmem>>, vector<16x128xf32>,
    return
  }
}

</mosaic_0001>

<bundles_post_ra>
// kernel: tpu_custom_call.1
= control target key start
LH: loop header
LB: loop body
LE: loop exit
PB: predicated region body
PF: predicated region fallthrough
CT: control target
= control target key end

     0   :  { %11 = vsyncpa [#allocation5], 0  ;;  %s873_s0 = inlined_call_operand.hbm [shape: bf16[16,128], index: 0, kind: input, shape index: {}]   ;;  %s874_s1 = inlined_call_operand.hbm [shape: bf16[16,16], index: 1, kind: input, shape index: {}]   ;;  %s875_s2 = inlined_call_operand.hbm [shape: bf16[128,256], index: 2, kind: input, shape index: {}]   ;;  %s876_s3 = inlined_call_operand.vmem [shape: f32[1,128], index: 3, kind: input, shape index: {}]   ;;  %s877_s4 = inlined_call_operand.hbm [shape: bf16[128,256], index: 4, kind: input, shape index: {}]   ;;  %s878_s5 = inlined_call_operand.vmem [shape: f32[1,128], index: 5, kind: input, shape index: {}]   ;;  %s879_s6 = inlined_call_operand.hbm [shape: f32[16,128], index: 6, kind: output, shape index: {}]  }
   0x1   :  { %12 = vsyncpa [#allocation8], 0 }
   0x2   :  { %13 = vsyncpa [#allocation6], 0  ;;  %s788_s21 = smov [#allocation7]  }
   0x3   :  { %s31_s22 = sshll.u32 %s788_s21, 4  ;;  %s32_s22 = int_to_ptr.vmem [resolvable:$true] %s31_s22 }
   0x4   :  { %s688_s23 = scalar_lea.vmem %s32_s22, 2048  ;;  %p693_p1 = scmp.lt.s32.totalorder %s32_s22, %s32_s22 }
   0x5   :  { %p689_p0 = scmp.ne.s32.totalorder %s32_s22, %s688_s23  ;;  %p694_p2 = scmp.lt.s32.totalorder %s688_s23, %s688_s23 }
   0x7   :  { %p695_p3 = por %p694_p2, %p693_p1 }
   0x9   :  { %p696_p4 = pnand %p695_p3, %p689_p0 }
   0xb   :  { %699 = shalt.err (!%p696_p4)
}
   0xc   :  { %s789_s24 = smov 128   ;;  %s790_s25 = smov 8  }
   0xd   :  { %37 = dma.hbm_to_vmem [thread:$0]  %s875_s2, 2048, %s32_s22, [#allocation8], %s789_s24, %s789_s24, %s790_s25  }
   0xe   :  { %s791_s28 = smov [#allocation4]  }
   0xf   :  { %s19_s29 = sshll.u32 %s791_s28, 4  ;;  %s20_s29 = int_to_ptr.vmem [resolvable:$true] %s19_s29 }
  0x10   :  { %s708_s30 = scalar_lea.vmem %s20_s29, 128  ;;  %p713_p6 = scmp.lt.s32.totalorder %s20_s29, %s20_s29 }
  0x11   :  { %p709_p5 = scmp.ne.s32.totalorder %s20_s29, %s708_s30  ;;  %p714_p7 = scmp.lt.s32.totalorder %s708_s30, %s708_s30 }
  0x13   :  { %p715_p8 = por %p714_p7, %p713_p6 }
  0x15   :  { %p716_p9 = pnand %p715_p8, %p709_p5 }
  0x17   :  { %719 = shalt.err (!%p716_p9)
}
  0x18   :  { %s792_s7 = smov 64   ;;  %s793_s8 = smov 4  }
  0x19   :  { %25 = dma.hbm_to_vmem [thread:$0]  %s873_s0, 128, %s20_s29, [#allocation5], %s792_s7, %s792_s7, %s793_s8  }
  0x1a   :  { %s794_s11 = smov [#allocation9]  }
  0x1b   :  { %s45_s12 = sshll.u32 %s794_s11, 4  ;;  %s46_s12 = int_to_ptr.vmem [resolvable:$true] %s45_s12 }
  0x1c   :  { %s728_s2 = scalar_lea.vmem %s46_s12, 2048  ;;  %p733_p11 = scmp.lt.s32.totalorder %s46_s12, %s46_s12 }
  0x1d   :  { %p729_p10 = scmp.ne.s32.totalorder %s46_s12, %s728_s2  ;;  %p734_p12 = scmp.lt.s32.totalorder %s728_s2, %s728_s2 }
  0x1f   :  { %p735_p13 = por %p734_p12, %p733_p11 }
  0x21   :  { %p736_p0 = pnand %p735_p13, %p729_p10 }
  0x23   :  { %739 = shalt.err (!%p736_p0)
}
  0x24   :  { %51 = dma.hbm_to_vmem [thread:$0]  %s877_s4, 2048, %s46_s12, [#allocation8], %s789_s24, %s789_s24, %s790_s25  }
  0x25   :  { %780 = dma.done.wait [#allocation5], 128  }
  0x26   :  { %781 = vsyncadd [#allocation5], 4294967168 }
  0x27   :  { %782 = dma.done.wait [#allocation8], 4096  }
  0x28   :  { %783 = vsyncadd [#allocation8], 4294963200  ;;  %v795_v0 = vmov 0   ;;  %v854_v1 = vld [vmem:[%s876_s3] ss:$0 sm:$0xff]  ;;  %v646_v18 = vld [vmem:[#allocation4] sm:$0xff]  }
  0x29   :  { %212 = vmatprep.mubr.bf16.mxu0 %v795_v0  ;;  %v622_v2 = vld [vmem:[#allocation7 + $0x74] ss:$8 sps:$4 sm:$0xff]   ;;  %v624_v3 = vld [vmem:[#allocation7 + $0x70] ss:$8 sps:$4 sm:$0xff]   ;;  %v625_v4 = vld [vmem:[#allocation7 + $0x64] ss:$8 sps:$4 sm:$0xff]  }
  0x2a   :  { %180 = vmatprep.subr.bf16.mxu0 %v622_v2  ;;  %v627_v5 = vld [vmem:[#allocation7 + $0x60] ss:$8 sps:$4 sm:$0xff]   ;;  %v628_v6 = vld [vmem:[#allocation7 + $0x54] ss:$8 sps:$4 sm:$0xff]   ;;  %v630_v7 = vld [vmem:[#allocation7 + $0x50] ss:$8 sps:$4 sm:$0xff]  }
  0x2b   :  { %181 = vmatpush1.bf16.msra.mxu0 %v624_v3  ;;  %v631_v8 = vld [vmem:[#allocation7 + $0x44] ss:$8 sps:$4 sm:$0xff]   ;;  %v633_v9 = vld [vmem:[#allocation7 + $0x40] ss:$8 sps:$4 sm:$0xff]   ;;  %v634_v10 = vld [vmem:[#allocation7 + $0x34] ss:$8 sps:$4 sm:$0xff]  }
  0x2c   :  { %182 = vmatprep.subr.bf16.mxu0 %v625_v4  ;;  %v636_v11 = vld [vmem:[#allocation7 + $0x30] ss:$8 sps:$4 sm:$0xff]   ;;  %v637_v12 = vld [vmem:[#allocation7 + $0x24] ss:$8 sps:$4 sm:$0xff]   ;;  %v639_v13 = vld [vmem:[#allocation7 + $0x20] ss:$8 sps:$4 sm:$0xff]  }
  0x2d   :  { %v640_v14 = vld [vmem:[#allocation7 + $0x14] ss:$8 sps:$4 sm:$0xff]   ;;  %v642_v15 = vld [vmem:[#allocation7 + $0x10] ss:$8 sps:$4 sm:$0xff]   ;;  %v643_v16 = vld [vmem:[#allocation7 + $0x4] ss:$8 sps:$4 sm:$0xff]  }
  0x2e   :  { %v645_v17 = vld [vmem:[#allocation7] ss:$8 sps:$4 sm:$0xff]   ;;  %s796_s3 = smov [#allocation2]  }
  0x2f   :  { %183 = vmatpush1.bf16.msra.mxu0 %v627_v5  ;;  %s71_s4 = sshll.u32 %s796_s3, 4  ;;  %s72_s4 = int_to_ptr.vmem [resolvable:$true] %s71_s4 }
  0x30   :  { %184 = vmatprep.subr.bf16.mxu0 %v628_v6  ;;  %s748_s16 = scalar_lea.vmem %s72_s4, 128  ;;  %p753_p2 = scmp.lt.s32.totalorder %s72_s4, %s72_s4 }
  0x31   :  { %p749_p1 = scmp.ne.s32.totalorder %s72_s4, %s748_s16  ;;  %p754_p3 = scmp.lt.s32.totalorder %s748_s16, %s748_s16 }
  0x33   :  { %185 = vmatpush1.bf16.msra.mxu0 %v630_v7  ;;  %p755_p4 = por %p754_p3, %p753_p2 }
  0x34   :  { %186 = vmatprep.subr.bf16.mxu0 %v631_v8 }
  0x35   :  { %p756_p5 = pnand %p755_p4, %p749_p1 }
  0x37   :  { %187 = vmatpush1.bf16.msra.mxu0 %v633_v9 }
  0x38   :  { %188 = vmatprep.subr.bf16.mxu0 %v634_v10 }
  0x3b   :  { %189 = vmatpush1.bf16.msra.mxu0 %v636_v11 }
  0x3c   :  { %190 = vmatprep.subr.bf16.mxu0 %v637_v12 }
  0x3f   :  { %191 = vmatpush1.bf16.msra.mxu0 %v639_v13 }
  0x40   :  { %192 = vmatprep.subr.bf16.mxu0 %v640_v14 }
  0x43   :  { %193 = vmatpush1.bf16.msra.mxu0 %v642_v15 }
  0x44   :  { %194 = vmatprep.subr.bf16.mxu0 %v643_v16 }
  0x47   :  { %195 = vmatpush1.bf16.msra.mxu0 %v645_v17 }
  0x4a   :  { %213 = vmatmul.mubr.bf16.vlgmr.msra.gmra.mxu0 %v646_v18 }
  0x4b   :  { %759 = shalt.err (!%p756_p5)  }
  0x4c   :  { %74 = dma.hbm_to_vmem [thread:$0]  %s874_s1, 128, %s72_s4, [#allocation3] }
 0x10a   :  { %v214_v19 = vpop.f32.mrf.mxu0 }
 0x10c   :  { %v216_v20 = vpop.f32.mrf.mxu0 }
 0x10e   :  { %v218_v21 = vpop.f32.mrf.mxu0 }
 0x110   :  { %v220_v22 = vpop.f32.mrf.mxu0 }
 0x111   :  { %784 = dma.done.wait [#allocation3], 128 }
 0x112   :  { %785 = vsyncadd [#allocation3], 4294967168  ;;  %v229_v23 = vpack.c.bf16 %v220_v22, %v216_v20  ;;  %v797_v24 = vmov 0.0   ;;  %vm798_vm0 = vmmov 0   ;;  %v647_v25 = vld [vmem:[#allocation2] sm:$0xff]   ;;  %vm252_vm1 = vcmask 130048  }
 0x113   :  { %598 = vmatprep.subr.bf16.mxu1 %v797_v24  ;;  %600 = vmatprep.mubr.msk.bf16.mxu1 %vm798_vm0, %v797_v24  ;;  %v650_v26 = vld [vmem:[#allocation9 + $0x74] ss:$8 sps:$4 sm:$0xff]   ;;  %v648_v27 = vld [vmem:[#allocation9 + $0x70] ss:$8 sps:$4 sm:$0xff]   ;;  %v653_v28 = vld [vmem:[#allocation9 + $0x64] ss:$8 sps:$4 sm:$0xff]   ;;  %v504_v59 = vlaneseq }
 0x114   :  { %599 = vmatpush3.bf16.msra.mxu1 %v229_v23  ;;  %604 = vmatprep.subr.bf16.mxu0 %v797_v24  ;;  %v651_v30 = vld [vmem:[#allocation9 + $0x60] ss:$8 sps:$4 sm:$0xff]   ;;  %v656_v31 = vld [vmem:[#allocation9 + $0x54] ss:$8 sps:$4 sm:$0xff]   ;;  %v654_v32 = vld [vmem:[#allocation9 + $0x50] ss:$8 sps:$4 sm:$0xff]  }
 0x115   :  { %606 = vmatprep.mubr.msk.bf16.mxu0 %vm798_vm0, %v797_v24  ;;  %236 = vxpose.xlu0.c.b16.start.end [1/1] (short) (narrow) %v647_v25, 16  ;;  %v659_v33 = vld [vmem:[#allocation9 + $0x44] ss:$8 sps:$4 sm:$0xff]   ;;  %v657_v34 = vld [vmem:[#allocation9 + $0x40] ss:$8 sps:$4 sm:$0xff]   ;;  %v505_v62 = vand.u32 127, %v504_v59 }
 0x116   :  { %407 = vmatprep.subr.bf16.mxu1 %v650_v26  ;;  %v662_v35 = vld [vmem:[#allocation9 + $0x34] ss:$8 sps:$4 sm:$0xff]   ;;  %v660_v36 = vld [vmem:[#allocation9 + $0x30] ss:$8 sps:$4 sm:$0xff]   ;;  %v665_v37 = vld [vmem:[#allocation9 + $0x24] ss:$8 sps:$4 sm:$0xff]  }
 0x117   :  { %v663_v38 = vld [vmem:[#allocation9 + $0x20] ss:$8 sps:$4 sm:$0xff]   ;;  %v668_v39 = vld [vmem:[#allocation9 + $0x14] ss:$8 sps:$4 sm:$0xff]   ;;  %v666_v40 = vld [vmem:[#allocation9 + $0x10] ss:$8 sps:$4 sm:$0xff]  }
 0x118   :  { %v671_v41 = vld [vmem:[#allocation9 + $0x4] ss:$8 sps:$4 sm:$0xff]   ;;  %v669_v42 = vld [vmem:[#allocation9] ss:$8 sps:$4 sm:$0xff]   ;;  %v592_v60 = vld [vmem:[%s878_s5] ss:$0 sm:$0xff] }
 0x119   :  { %vm506_vm2 = vcmp.lt.s32.totalorder %v505_v62, 4  ;;  %s799_s5 = smov [#allocation10]  }
 0x11a   :  { %s536_s20 = sshll.u32 %s799_s5, 4  ;;  %s537_s20 = int_to_ptr.vmem [resolvable:$true] %s536_s20 }
 0x11b   :  { %s760_s21 = scalar_lea.vmem %s537_s20, 256  ;;  %p765_p7 = scmp.lt.s32.totalorder %s537_s20, %s537_s20 }
 0x11c   :  { %p761_p6 = scmp.ne.s32.totalorder %s537_s20, %s760_s21  ;;  %p766_p8 = scmp.lt.s32.totalorder %s760_s21, %s760_s21 }
 0x11e   :  { %p767_p9 = por %p766_p8, %p765_p7 }
 0x120   :  { %p768_p10 = pnand %p767_p9, %p761_p6 }
 0x177   :  { %v244_v29 = vpop.trf.xlu0 }
 0x178   :  { %601 = vmatmul.mubr.msk.bf16.vlgmr.msra.gmra.mxu1 %vm252_vm1, %v244_v29 }
 0x179   :  { %408 = vmatpush1.bf16.msra.mxu1 %v648_v27  ;;  %439 = vmatprep.mubr.bf16.mxu1 %v795_v0 }
 0x17a   :  { %409 = vmatprep.subr.bf16.mxu1 %v653_v28 }
 0x17d   :  { %410 = vmatpush1.bf16.msra.mxu1 %v651_v30 }
 0x17e   :  { %411 = vmatprep.subr.bf16.mxu1 %v656_v31 }
 0x181   :  { %412 = vmatpush1.bf16.msra.mxu1 %v654_v32 }
 0x182   :  { %413 = vmatprep.subr.bf16.mxu1 %v659_v33 }
 0x185   :  { %414 = vmatpush1.bf16.msra.mxu1 %v657_v34 }
 0x186   :  { %415 = vmatprep.subr.bf16.mxu1 %v662_v35 }
 0x189   :  { %416 = vmatpush1.bf16.msra.mxu1 %v660_v36 }
 0x18a   :  { %417 = vmatprep.subr.bf16.mxu1 %v665_v37 }
 0x18d   :  { %418 = vmatpush1.bf16.msra.mxu1 %v663_v38 }
 0x18e   :  { %419 = vmatprep.subr.bf16.mxu1 %v668_v39 }
 0x191   :  { %420 = vmatpush1.bf16.msra.mxu1 %v666_v40 }
 0x192   :  { %421 = vmatprep.subr.bf16.mxu1 %v671_v41 }
 0x195   :  { %422 = vmatpush1.bf16.msra.mxu1 %v669_v42 }
 0x238   :  { %v290_v43 = vpop.f32.mrf.mxu1 }
 0x239   :  { %v297_v44 = vadd.f32 %v290_v43, %v214_v19 }
 0x23a   :  { %v602_v45 = vpop.f32.mrf.mxu1 }
 0x23b   :  { %v305_v47 = vadd.f32 %v854_v1, %v297_v44 }
 0x23c   :  { %v293_v46 = vpop.f32.mrf.mxu1 }
 0x23d   :  { %v298_v48 = vadd.f32 %v293_v46, %v218_v21  ;;  %v307_v51 = vmax.f32 %v305_v47, 0.0 }
 0x23e   :  { %v603_v49 = vpop.f32.mrf.mxu1 }
 0x23f   :  { %v306_v50 = vadd.f32 %v854_v1, %v298_v48 }
 0x241   :  { %v308_v52 = vmax.f32 %v306_v50, 0.0 }
 0x243   :  { %v326_v53 = vpack.c.bf16 %v308_v52, %v307_v51 }
 0x245   :  { %440 = vmatmul.mubr.bf16.vlgmr.msra.gmra.mxu1 %v326_v53 }
 0x305   :  { %v441_v54 = vpop.f32.mrf.mxu1 }
 0x307   :  { %v443_v55 = vpop.f32.mrf.mxu1 }
 0x309   :  { %v445_v56 = vpop.f32.mrf.mxu1 }
 0x30b   :  { %v447_v57 = vpop.f32.mrf.mxu1 }
 0x30c   :  { %v450_v58 = vpack.c.bf16 %v447_v57, %v443_v55 }
 0x30e   :  { %605 = vmatpush3.bf16.msra.mxu0 %v450_v58 }
 0x311   :  { %607 = vmatmul.mubr.msk.bf16.vlgmr.msra.gmra.mxu0 %vm252_vm1, %v244_v29 }
 0x3d1   :  { %v485_v61 = vpop.f32.mrf.mxu0 }
 0x3d2   :  { %v492_v63 = vadd.f32 %v485_v61, %v441_v54 }
 0x3d3   :  { %v608_v0 = vpop.f32.mrf.mxu0 }
 0x3d4   :  { %v500_v1 = vadd.f32 %v592_v60, %v492_v63 }
 0x3d5   :  { %v488_v2 = vpop.f32.mrf.mxu0 }
 0x3d6   :  { %v493_v3 = vadd.f32 %v488_v2, %v445_v56  ;;  %v502_v4 = vmax.f32 %v500_v1, 0.0 }
 0x3d7   :  { %v609_v5 = vpop.f32.mrf.mxu0 }
 0x3d8   :  { %v501_v6 = vadd.f32 %v592_v60, %v493_v3  ;;  %v507_v7 = vsel %vm506_vm2, %v502_v4, -inf }
 0x3d9   :  { %509 = vmax.xlane.f32.xlu0 %v507_v7 }
 0x3da   :  { %v503_v8 = vmax.f32 %v501_v6, 0.0 }
 0x3dc   :  { %v508_v9 = vsel %vm506_vm2, %v503_v8, -inf }
 0x3dd   :  { %511 = vmax.xlane.f32.xlu1 %v508_v9 }
 0x462   :  { %v510_v10 = vpop.xlane.xlu0 %509 }
 0x463   :  { %v513_v11 = vsub.f32 %v507_v7, %v510_v10 }
 0x465   :  { %v515_v12 = vmul.f32 1.442695, %v513_v11 }
 0x466   :  { %v512_v13 = vpop.xlane.xlu1 %511 }
 0x467   :  { %672 = vpow2.f32 %v515_v12  ;;  %v514_v14 = vsub.f32 %v508_v9, %v512_v13 }
 0x469   :  { %v517_v15 = vmul.f32 1.442695, %v514_v14 }
 0x46b   :  { %674 = vpow2.f32 %v517_v15 }
 0x474   :  { %v673_v16 = vpop.eup %672 }
 0x475   :  { %519 = vadd.xlane.f32.xlu1 %v673_v16 }
 0x478   :  { %v675_v17 = vpop.eup %674 }
 0x479   :  { %521 = vadd.xlane.f32.xlu1 %v675_v17 }
 0x4fe   :  { %v520_v18 = vpop.xlane.xlu1 %519 }
 0x4ff   :  { %676 = vlog2.f32 %v520_v18 }
 0x502   :  { %v522_v19 = vpop.xlane.xlu1 %521 }
 0x503   :  { %678 = vlog2.f32 %v522_v19 }
 0x50c   :  { %v677_v20 = vpop.eup %676 }
 0x50d   :  { %v524_v21 = vmul.f32 0.6931472, %v677_v20 }
 0x50f   :  { %v527_v22 = vsub.f32 %v513_v11, %v524_v21 }
 0x510   :  { %v679_v23 = vpop.eup %678 }
 0x511   :  { %v526_v24 = vmul.f32 0.6931472, %v679_v23  ;;  %529 = vst [vmem:[#allocation10] sm:$0xff] %v527_v22 }
 0x513   :  { %v528_v25 = vsub.f32 %v514_v14, %v526_v24 }
 0x515   :  { %530 = vst [vmem:[#allocation10 + $0x8] sm:$0xff] %v528_v25 }
 0x516   :  { %771 = shalt.err (!%p768_p10)
}
 0x517   :  { %542 = dma.vmem_to_hbm [thread:$0]  %s537_s20, 256, %s879_s6, [#allocation6], %s789_s24, %s789_s24, %s790_s25  }
 0x518   :  { %786 = dma.done.wait [#allocation6], 256  }
 0x519   :  { %787 = vsyncadd [#allocation6], 4294967040 }
 0x51a   :  { %546 = vsyncpa [#allocation5], 1 }
 0x51b   :  { %547 = vsyncpa [#allocation8], 1 }
 0x51c   :  { %548 = vsyncpa [#allocation6], 1 }
 0x51d   :  { %549 = vsyncmov [#allocation3] }
 0x520   :  { %s550_s26 = vpop.sfrf %549 }
 0x521   :  { %p593_p11 = scmp.ne.s32.totalorder %s550_s26, 0 }
 0x523   :  { %554 = shalt.err (%p593_p11)  }

</bundles_post_ra>
